<compile_context>
chip_gen: v7x
topology: tpu7x:2x2x1
jax: 0.10.0
libtpu: 0.0.40
codegen_flags: <defaults>
</compile_context>

<pallas_src>
import functools

import jax
import jax.numpy as jnp
from jax.experimental import pallas as pl
from jax.experimental.pallas import tpu as pltpu


def _round_up(x, m):
    return (x + m - 1) // m * m


# ----------------------------- Pallas kernels ------------------------------


def _make_kernel(add_residual, apply_relu):
    """Build kernel: out = relu?( taps @ w + bias (+ residual) )."""

    def _body(taps_ref, w_ref, bias_ref, res_ref, out_ref):
        acc = jnp.dot(taps_ref[...], w_ref[...],
                      preferred_element_type=jnp.float32)
        out = acc + bias_ref[...]
        if res_ref is not None:
            # Residual travels in bf16 (half the DMA bytes); upcast on the VPU.
            out = out + res_ref[...].astype(jnp.float32)
        if apply_relu:
            out = jnp.maximum(out, 0.0)
        out_ref[...] = out.astype(out_ref.dtype)

    if add_residual:
        def kernel(taps_ref, w_ref, bias_ref, res_ref, out_ref):
            _body(taps_ref, w_ref, bias_ref, res_ref, out_ref)
    else:
        def kernel(taps_ref, w_ref, bias_ref, out_ref):
            _body(taps_ref, w_ref, bias_ref, None, out_ref)
    return kernel


def _choose_tm(M, KC, Cout, res_itemsize, out_itemsize, tm_target,
               vmem_budget):
    """Pick the M tile: multiple of 8, >=2 grid steps when M allows it (keeps
    both v7x TensorCores busy), and a working set under `vmem_budget` so the
    same code is safe on v5e (16 MiB scoped default) and v7x (64 MiB)."""
    m8 = _round_up(M, 8)
    tm = min(tm_target, m8)
    if m8 >= 256:
        tm = min(tm, _round_up((M + 1) // 2, 8))

    def working_set(t):
        b = 2 * t * KC * 2                        # taps bf16, double-buffered
        b += KC * Cout * 2 + Cout * 4             # weight (single) + bias
        b += 2 * t * Cout * out_itemsize          # output, double-buffered
        if res_itemsize:
            b += 2 * t * Cout * res_itemsize      # residual, double-buffered
        return b

    while tm > 128 and working_set(tm) > vmem_budget:
        tm = _round_up(tm // 2, 8)
    return tm


def conv_bn_pallas(taps, w, bias, residual=None, apply_relu=True,
                   out_dtype=jnp.float32, tm=512, vmem_budget=20 << 20):
    """Fused conv (im2col matmul) + folded-BN bias (+ residual) (+ ReLU).

    taps:     (M, K*Cin)    bf16 im2col activation matrix (built at source)
    w:        (K*Cin, Cout) bf16 conv weight with BN scale pre-folded
    bias:     (Cout,)       f32 folded BN bias
    residual: (M, Cout) bf16 or None (upcast + added in f32 in-kernel)
    returns:  (M, Cout) out_dtype
    """
    M, KC = taps.shape
    Cout = w.shape[-1]
    bias = bias.reshape(1, Cout).astype(jnp.float32)

    res_isize = residual.dtype.itemsize if residual is not None else 0
    out_isize = jnp.dtype(out_dtype).itemsize
    tm = _choose_tm(M, KC, Cout, res_isize, out_isize, tm, vmem_budget)
    # Ragged tail: Pallas masks the partial last block (rows are independent,
    # so no pad / slice passes over the 9x-amplified taps tensor are needed).
    grid = (pl.cdiv(M, tm),)

    # Weight / bias never change across the grid; single-buffer them once the
    # weight is big enough for the saved VMEM to matter (deep ResNet layers).
    const_kwargs = {}
    if KC * Cout * w.dtype.itemsize >= (1 << 20):
        const_kwargs = dict(pipeline_mode=pl.Buffered(1))

    in_specs = [
        pl.BlockSpec((tm, KC), lambda i: (i, 0)),                     # taps
        pl.BlockSpec((KC, Cout), lambda i: (0, 0), **const_kwargs),   # weight
        pl.BlockSpec((1, Cout), lambda i: (0, 0), **const_kwargs),    # bias
    ]
    args = [taps, w, bias]
    if residual is not None:
        in_specs.append(pl.BlockSpec((tm, Cout), lambda i: (i, 0)))
        args.append(residual)

    bytes_accessed = (taps.size * taps.dtype.itemsize
                      + w.size * w.dtype.itemsize
                      + bias.size * 4
                      + (residual.size * res_isize if residual is not None
                         else 0)
                      + M * Cout * out_isize)
    cost = pl.CostEstimate(flops=2 * M * KC * Cout, transcendentals=0,
                           bytes_accessed=bytes_accessed)

    kernel = _make_kernel(add_residual=residual is not None,
                          apply_relu=apply_relu)

    return pl.pallas_call(
        kernel,
        out_shape=jax.ShapeDtypeStruct((M, Cout), out_dtype),
        grid_spec=pltpu.PrefetchScalarGridSpec(
            num_scalar_prefetch=0,
            grid=grid,
            in_specs=in_specs,
            out_specs=pl.BlockSpec((tm, Cout), lambda i: (i, 0)),
        ),
        compiler_params=pltpu.CompilerParams(
            dimension_semantics=("parallel",),
            # Explicit scoped-VMEM limit (safe on all gens: < 64 MiB physical
            # on v7x, well under 128 MiB on v5e/v6e), instead of per-chip
            # defaults (v5e's 16 MiB default would choke deep layers).
            vmem_limit_bytes=48 << 20),
        cost_estimate=cost,
    )(*args)


# ------------------------------- JAX glue -----------------------------------


def extract_taps(x_nhwc, ksize, stride, padding):
    """im2col: (N,H,W,C) -> (N*Ho*Wo, ksize*ksize*C), [kh][kw][c] ordering.

    Preserves the input dtype (callers pass bf16 so the 9x-amplified taps
    stream is written/read in bf16).
    """
    N, H, W, C = x_nhwc.shape
    Ho = (H + 2 * padding - ksize) // stride + 1
    Wo = (W + 2 * padding - ksize) // stride + 1
    xp = x_nhwc
    if padding:
        xp = jnp.pad(x_nhwc, ((0, 0), (padding, padding), (padding, padding),
                              (0, 0)))
    cols = []
    for kh in range(ksize):
        for kw in range(ksize):
            sl = jax.lax.slice(
                xp,
                (0, kh, kw, 0),
                (N, kh + stride * (Ho - 1) + 1, kw + stride * (Wo - 1) + 1, C),
                (1, stride, stride, 1))
            cols.append(sl.reshape(N * Ho * Wo, C))
    return jnp.concatenate(cols, axis=1), (N, Ho, Wo)


def fold_bn(gamma, beta, running_mean, running_var, eps=1e-5):
    scale = gamma / jnp.sqrt(running_var + eps)
    bias = beta - running_mean * scale
    return scale, bias  # both (Cout,)


def init_basic_block_params(key, in_planes, planes, stride):
    ks = jax.random.split(key, 12)
    p = {
        # conv weights stored HWIO (3,3,Cin,Cout); equivalent to PyTorch OIHW
        "w1": 0.1 * jax.random.normal(ks[0], (3, 3, in_planes, planes),
                                      jnp.float32),
        "bn1_gamma": jax.random.uniform(ks[1], (planes,), jnp.float32, 0.5, 1.5),
        "bn1_beta": 0.1 * jax.random.normal(ks[2], (planes,), jnp.float32),
        "bn1_mean": 0.1 * jax.random.normal(ks[3], (planes,), jnp.float32),
        "bn1_var": jax.random.uniform(ks[4], (planes,), jnp.float32, 0.5, 1.5),
        "w2": 0.1 * jax.random.normal(ks[5], (3, 3, planes, planes),
                                      jnp.float32),
        "bn2_gamma": jax.random.uniform(ks[6], (planes,), jnp.float32, 0.5, 1.5),
        "bn2_beta": 0.1 * jax.random.normal(ks[7], (planes,), jnp.float32),
        "bn2_mean": 0.1 * jax.random.normal(ks[8], (planes,), jnp.float32),
        "bn2_var": jax.random.uniform(ks[9], (planes,), jnp.float32, 0.5, 1.5),
    }
    # Presence of "ws" (a static dict-key fact, safe under jit) encodes whether
    # the block has a projection shortcut -- no traced booleans in params.
    if stride != 1 or in_planes != planes:
        p["ws"] = 0.1 * jax.random.normal(ks[10], (1, 1, in_planes, planes),
                                          jnp.float32)
        ks2 = jax.random.split(ks[11], 4)
        p["bns_gamma"] = jax.random.uniform(ks2[0], (planes,), jnp.float32,
                                            0.5, 1.5)
        p["bns_beta"] = 0.1 * jax.random.normal(ks2[1], (planes,), jnp.float32)
        p["bns_mean"] = 0.1 * jax.random.normal(ks2[2], (planes,), jnp.float32)
        p["bns_var"] = jax.random.uniform(ks2[3], (planes,), jnp.float32,
                                          0.5, 1.5)
    return p


def basic_block_forward(x_nchw, params, stride):
    """Matches BasicBlock.forward (eval-mode BN). Input/output are NCHW."""
    # Single cast to bf16 at the source: every downstream im2col / residual
    # stream is bf16 (halves the dominant HBM traffic).
    x = jnp.transpose(x_nchw, (0, 2, 3, 1)).astype(jnp.bfloat16)  # NHWC
    N, H, W, Cin = x.shape
    planes = params["w1"].shape[-1]

    s1, b1 = fold_bn(params["bn1_gamma"], params["bn1_beta"],
                     params["bn1_mean"], params["bn1_var"])
    s2, b2 = fold_bn(params["bn2_gamma"], params["bn2_beta"],
                     params["bn2_mean"], params["bn2_var"])

    # Fold BN scale directly into the conv weights; ship them as bf16.
    w1 = (params["w1"] * s1).reshape(9 * Cin, planes).astype(jnp.bfloat16)
    w2 = (params["w2"] * s2).reshape(9 * planes, planes).astype(jnp.bfloat16)

    # conv1 (3x3, stride) + bn1 + relu  -> intermediate kept in bf16
    taps1, (n, Ho, Wo) = extract_taps(x, 3, stride, 1)
    out1 = conv_bn_pallas(taps1, w1, b1, apply_relu=True,
                          out_dtype=jnp.bfloat16)

    # shortcut branch (projection iff "ws" present -- static under jit)
    if "ws" in params:
        ss, bs = fold_bn(params["bns_gamma"], params["bns_beta"],
                         params["bns_mean"], params["bns_var"])
        ws = (params["ws"] * ss).reshape(Cin, planes).astype(jnp.bfloat16)
        taps_s, _ = extract_taps(x, 1, stride, 0)
        shortcut = conv_bn_pallas(taps_s, ws, bs, apply_relu=False,
                                  out_dtype=jnp.bfloat16)
    else:
        shortcut = x.reshape(N * H * W, Cin)  # already bf16

    # conv2 (3x3, stride 1) + bn2 + residual add + relu (all fused in-kernel)
    out1_nhwc = out1.reshape(n, Ho, Wo, planes)
    taps2, _ = extract_taps(out1_nhwc, 3, 1, 1)
    out2 = conv_bn_pallas(taps2, w2, b2, residual=shortcut, apply_relu=True,
                          out_dtype=jnp.float32)

    out_nhwc = out2.reshape(n, Ho, Wo, planes)
    return jnp.transpose(out_nhwc, (0, 3, 1, 2))  # back to NCHW


# --------------------------- pure-JAX reference ------------------------------
# Reference mirrors the kernel-path numerics (bf16 conv operands, f32
# accumulation, BN scale folded into weights, residual rounded through bf16)
# so tolerances stay tight.


def _ref_conv(x_nhwc, w_hwio, stride, padding):
    return jax.lax.conv_general_dilated(
        x_nhwc.astype(jnp.bfloat16), w_hwio.astype(jnp.bfloat16),
        (stride, stride), ((padding, padding), (padding, padding)),
        dimension_numbers=("NHWC", "HWIO", "NHWC"),
        preferred_element_type=jnp.float32)


def basic_block_reference(x_nchw, params, stride):
    x = jnp.transpose(x_nchw, (0, 2, 3, 1)).astype(jnp.float32)
    s1, b1 = fold_bn(params["bn1_gamma"], params["bn1_beta"],
                     params["bn1_mean"], params["bn1_var"])
    s2, b2 = fold_bn(params["bn2_gamma"], params["bn2_beta"],
                     params["bn2_mean"], params["bn2_var"])
    w1 = params["w1"] * s1
    w2 = params["w2"] * s2
    out = jnp.maximum(_ref_conv(x, w1, stride, 1) + b1, 0.0)
    out = _ref_conv(out, w2, 1, 1) + b2
    if "ws" in params:
        ss, bs = fold_bn(params["bns_gamma"], params["bns_beta"],
                         params["bns_mean"], params["bns_var"])
        ws = params["ws"] * ss
        sc = _ref_conv(x, ws, stride, 0) + bs
    else:
        sc = x
    # Kernel path carries the residual in bf16; mirror that rounding here.
    sc = sc.astype(jnp.bfloat16).astype(jnp.float32)
    out = jnp.maximum(out + sc, 0.0)
    return jnp.transpose(out, (0, 3, 1, 2))


# --------------------------------- main --------------------------------------


if __name__ == "__main__":
    key = jax.random.PRNGKey(0)
    k_x, k_p = jax.random.split(key)

    in_planes, planes, stride = 4, 8, 1   # channel change -> 1x1 conv shortcut
    x = jax.random.normal(k_x, (2, in_planes, 16, 16), jnp.float32)  # NCHW

    params = init_basic_block_params(k_p, in_planes, planes, stride)

    fwd = jax.jit(functools.partial(basic_block_forward, stride=stride))
    out = jax.block_until_ready(fwd(x, params))

    ref = jax.block_until_ready(basic_block_reference(x, params, stride))
    assert out.shape == ref.shape, (out.shape, ref.shape)
    max_err = float(jnp.max(jnp.abs(out - ref)))
    assert jnp.allclose(out, ref, atol=1e-2, rtol=1e-2), max_err

    print("KERNEL_OK")
</pallas_src>

<mosaic_0001>
module attributes {stable_mosaic.version = 11 : i64} {
  func.func @kernel(%arg0: i32, %arg1: memref<256x36xbf16, #tpu.memory_space<vmem>>, %arg2: memref<36x8xbf16, #tpu.memory_space<vmem>>, %arg3: memref<1x8xf32, #tpu.memory_space<vmem>>, %arg4: memref<256x8xbf16, #tpu.memory_space<vmem>>) attributes {dimension_semantics = [#tpu.dimension_semantics<parallel>], iteration_bounds = array<i64: 2>, scalar_prefetch = 0 : i64, scratch_operands = 0 : i64, tpu.core_type = #tpu.core_type<tc>, window_params = [{transform_indices = @transform_0, window_bounds = array<i64: 256, 36>}, {pipeline_mode = #tpu.pipeline_mode<synchronous>, transform_indices = @transform_1, window_bounds = array<i64: 36, 8>}, {pipeline_mode = #tpu.pipeline_mode<synchronous>, transform_indices = @transform_2, window_bounds = array<i64: 1, 8>}, {transform_indices = @transform_3, window_bounds = array<i64: 256, 8>}]} {
    %c0 = arith.constant 0 : index
    %c0_0 = arith.constant 0 : index
    %0 = vector.load %arg1[%c0, %c0_0] : memref<256x36xbf16, #tpu.memory_space<vmem>>, vector<256x36xbf16>
    %c0_1 = arith.constant 0 : index
    %c0_2 = arith.constant 0 : index
    %1 = vector.load %arg2[%c0_1, %c0_2] : memref<36x8xbf16, #tpu.memory_space<vmem>>, vector<36x8xbf16>
    %cst = arith.constant dense<0.000000e+00> : vector<256x8xf32>
    %2 = tpu.matmul %0, %1, %cst {dimension_numbers = #tpu.dot_dimension_numbers<[1], [0], [0], [1], [0, 0, 1, 1], [], []>} : vector<256x36xbf16>, vector<36x8xbf16>, vector<256x8xf32> -> vector<256x8xf32>
    %c0_3 = arith.constant 0 : index
    %c0_4 = arith.constant 0 : index
    %3 = vector.load %arg3[%c0_3, %c0_4] : memref<1x8xf32, #tpu.memory_space<vmem>>, vector<1x8xf32>
    %4 = vector.broadcast %3 : vector<1x8xf32> to vector<256x8xf32>
    %5 = arith.addf %2, %4 : vector<256x8xf32>
    %cst_5 = arith.constant 0.000000e+00 : f32
    %6 = vector.broadcast %cst_5 : f32 to vector<256x8xf32>
    %7 = arith.maximumf %5, %6 : vector<256x8xf32>
    %8 = arith.truncf %7 : vector<256x8xf32> to vector<256x8xbf16>
    %c0_6 = arith.constant 0 : index
    %c0_7 = arith.constant 0 : index
    %9 = vector.load %arg4[%c0_6, %c0_7] : memref<256x8xbf16, #tpu.memory_space<vmem>>, vector<256x8xbf16>
    tpu.vector_store %arg4[%c0_6, %c0_7], %8 {strides = array<i32>} : memref<256x8xbf16, #tpu.memory_space<vmem>>, vector<256x8xbf16>,
    return
  }
  func.func @transform_0(%arg0: i32) -> (i32, i32) {
    %c0_i32 = arith.constant 0 : i32
    %c0_i32_0 = arith.constant 0 : i32
    return %arg0, %c0_i32 : i32, i32
  }
  func.func @transform_1(%arg0: i32) -> (i32, i32) {
    %c0_i32 = arith.constant 0 : i32
    %c0_i32_0 = arith.constant 0 : i32
    %c0_i32_1 = arith.constant 0 : i32
    return %c0_i32, %c0_i32_0 : i32, i32
  }
  func.func @transform_2(%arg0: i32) -> (i32, i32) {
    %c0_i32 = arith.constant 0 : i32
    %c0_i32_0 = arith.constant 0 : i32
    %c0_i32_1 = arith.constant 0 : i32
    return %c0_i32, %c0_i32_0 : i32, i32
  }
  func.func @transform_3(%arg0: i32) -> (i32, i32) {
    %c0_i32 = arith.constant 0 : i32
    %c0_i32_0 = arith.constant 0 : i32
    return %arg0, %c0_i32 : i32, i32
  }
}

module attributes {stable_mosaic.version = 11 : i64} {
  func.func @kernel(%arg0: i32, %arg1: memref<256x4xbf16, #tpu.memory_space<vmem>>, %arg2: memref<4x8xbf16, #tpu.memory_space<vmem>>, %arg3: memref<1x8xf32, #tpu.memory_space<vmem>>, %arg4: memref<256x8xbf16, #tpu.memory_space<vmem>>) attributes {dimension_semantics = [#tpu.dimension_semantics<parallel>], iteration_bounds = array<i64: 2>, scalar_prefetch = 0 : i64, scratch_operands = 0 : i64, tpu.core_type = #tpu.core_type<tc>, window_params = [{transform_indices = @transform_0, window_bounds = array<i64: 256, 4>}, {pipeline_mode = #tpu.pipeline_mode<synchronous>, transform_indices = @transform_1, window_bounds = array<i64: 4, 8>}, {pipeline_mode = #tpu.pipeline_mode<synchronous>, transform_indices = @transform_2, window_bounds = array<i64: 1, 8>}, {transform_indices = @transform_3, window_bounds = array<i64: 256, 8>}]} {
    %c0 = arith.constant 0 : index
    %c0_0 = arith.constant 0 : index
    %0 = vector.load %arg1[%c0, %c0_0] : memref<256x4xbf16, #tpu.memory_space<vmem>>, vector<256x4xbf16>
    %c0_1 = arith.constant 0 : index
    %c0_2 = arith.constant 0 : index
    %1 = vector.load %arg2[%c0_1, %c0_2] : memref<4x8xbf16, #tpu.memory_space<vmem>>, vector<4x8xbf16>
    %cst = arith.constant dense<0.000000e+00> : vector<256x8xf32>
    %2 = tpu.matmul %0, %1, %cst {dimension_numbers = #tpu.dot_dimension_numbers<[1], [0], [0], [1], [0, 0, 1, 1], [], []>} : vector<256x4xbf16>, vector<4x8xbf16>, vector<256x8xf32> -> vector<256x8xf32>
    %c0_3 = arith.constant 0 : index
    %c0_4 = arith.constant 0 : index
    %3 = vector.load %arg3[%c0_3, %c0_4] : memref<1x8xf32, #tpu.memory_space<vmem>>, vector<1x8xf32>
    %4 = vector.broadcast %3 : vector<1x8xf32> to vector<256x8xf32>
    %5 = arith.addf %2, %4 : vector<256x8xf32>
    %6 = arith.truncf %5 : vector<256x8xf32> to vector<256x8xbf16>
    %c0_5 = arith.constant 0 : index
    %c0_6 = arith.constant 0 : index
    %7 = vector.load %arg4[%c0_5, %c0_6] : memref<256x8xbf16, #tpu.memory_space<vmem>>, vector<256x8xbf16>
    tpu.vector_store %arg4[%c0_5, %c0_6], %6 {strides = array<i32>} : memref<256x8xbf16, #tpu.memory_space<vmem>>, vector<256x8xbf16>,
    return
  }
  func.func @transform_0(%arg0: i32) -> (i32, i32) {
    %c0_i32 = arith.constant 0 : i32
    %c0_i32_0 = arith.constant 0 : i32
    return %arg0, %c0_i32 : i32, i32
  }
  func.func @transform_1(%arg0: i32) -> (i32, i32) {
    %c0_i32 = arith.constant 0 : i32
    %c0_i32_0 = arith.constant 0 : i32
    %c0_i32_1 = arith.constant 0 : i32
    return %c0_i32, %c0_i32_0 : i32, i32
  }
  func.func @transform_2(%arg0: i32) -> (i32, i32) {
    %c0_i32 = arith.constant 0 : i32
    %c0_i32_0 = arith.constant 0 : i32
    %c0_i32_1 = arith.constant 0 : i32
    return %c0_i32, %c0_i32_0 : i32, i32
  }
  func.func @transform_3(%arg0: i32) -> (i32, i32) {
    %c0_i32 = arith.constant 0 : i32
    %c0_i32_0 = arith.constant 0 : i32
    return %arg0, %c0_i32 : i32, i32
  }
}

module attributes {stable_mosaic.version = 11 : i64} {
  func.func @kernel(%arg0: i32, %arg1: memref<256x72xbf16, #tpu.memory_space<vmem>>, %arg2: memref<72x8xbf16, #tpu.memory_space<vmem>>, %arg3: memref<1x8xf32, #tpu.memory_space<vmem>>, %arg4: memref<256x8xbf16, #tpu.memory_space<vmem>>, %arg5: memref<256x8xf32, #tpu.memory_space<vmem>>) attributes {dimension_semantics = [#tpu.dimension_semantics<parallel>], iteration_bounds = array<i64: 2>, scalar_prefetch = 0 : i64, scratch_operands = 0 : i64, tpu.core_type = #tpu.core_type<tc>, window_params = [{transform_indices = @transform_0, window_bounds = array<i64: 256, 72>}, {pipeline_mode = #tpu.pipeline_mode<synchronous>, transform_indices = @transform_1, window_bounds = array<i64: 72, 8>}, {pipeline_mode = #tpu.pipeline_mode<synchronous>, transform_indices = @transform_2, window_bounds = array<i64: 1, 8>}, {transform_indices = @transform_3, window_bounds = array<i64: 256, 8>}, {transform_indices = @transform_4, window_bounds = array<i64: 256, 8>}]} {
    %c0 = arith.constant 0 : index
    %c0_0 = arith.constant 0 : index
    %0 = vector.load %arg1[%c0, %c0_0] : memref<256x72xbf16, #tpu.memory_space<vmem>>, vector<256x72xbf16>
    %c0_1 = arith.constant 0 : index
    %c0_2 = arith.constant 0 : index
    %1 = vector.load %arg2[%c0_1, %c0_2] : memref<72x8xbf16, #tpu.memory_space<vmem>>, vector<72x8xbf16>
    %cst = arith.constant dense<0.000000e+00> : vector<256x8xf32>
    %2 = tpu.matmul %0, %1, %cst {dimension_numbers = #tpu.dot_dimension_numbers<[1], [0], [0], [1], [0, 0, 1, 1], [], []>} : vector<256x72xbf16>, vector<72x8xbf16>, vector<256x8xf32> -> vector<256x8xf32>
    %c0_3 = arith.constant 0 : index
    %c0_4 = arith.constant 0 : index
    %3 = vector.load %arg3[%c0_3, %c0_4] : memref<1x8xf32, #tpu.memory_space<vmem>>, vector<1x8xf32>
    %4 = vector.broadcast %3 : vector<1x8xf32> to vector<256x8xf32>
    %5 = arith.addf %2, %4 : vector<256x8xf32>
    %c0_5 = arith.constant 0 : index
    %c0_6 = arith.constant 0 : index
    %6 = vector.load %arg4[%c0_5, %c0_6] : memref<256x8xbf16, #tpu.memory_space<vmem>>, vector<256x8xbf16>
    %7 = arith.extf %6 : vector<256x8xbf16> to vector<256x8xf32>
    %8 = arith.addf %5, %7 : vector<256x8xf32>
    %cst_7 = arith.constant 0.000000e+00 : f32
    %9 = vector.broadcast %cst_7 : f32 to vector<256x8xf32>
    %10 = arith.maximumf %8, %9 : vector<256x8xf32>
    %c0_8 = arith.constant 0 : index
    %c0_9 = arith.constant 0 : index
    %11 = vector.load %arg5[%c0_8, %c0_9] : memref<256x8xf32, #tpu.memory_space<vmem>>, vector<256x8xf32>
    tpu.vector_store %arg5[%c0_8, %c0_9], %10 {strides = array<i32>} : memref<256x8xf32, #tpu.memory_space<vmem>>, vector<256x8xf32>,
    return
  }
  func.func @transform_0(%arg0: i32) -> (i32, i32) {
    %c0_i32 = arith.constant 0 : i32
    %c0_i32_0 = arith.constant 0 : i32
    return %arg0, %c0_i32 : i32, i32
  }
  func.func @transform_1(%arg0: i32) -> (i32, i32) {
    %c0_i32 = arith.constant 0 : i32
    %c0_i32_0 = arith.constant 0 : i32
    %c0_i32_1 = arith.constant 0 : i32
    return %c0_i32, %c0_i32_0 : i32, i32
  }
  func.func @transform_2(%arg0: i32) -> (i32, i32) {
    %c0_i32 = arith.constant 0 : i32
    %c0_i32_0 = arith.constant 0 : i32
    %c0_i32_1 = arith.constant 0 : i32
    return %c0_i32, %c0_i32_0 : i32, i32
  }
  func.func @transform_3(%arg0: i32) -> (i32, i32) {
    %c0_i32 = arith.constant 0 : i32
    %c0_i32_0 = arith.constant 0 : i32
    return %arg0, %c0_i32 : i32, i32
  }
  func.func @transform_4(%arg0: i32) -> (i32, i32) {
    %c0_i32 = arith.constant 0 : i32
    %c0_i32_0 = arith.constant 0 : i32
    return %arg0, %c0_i32 : i32, i32
  }
}

</mosaic_0001>

<bundles_post_ra>
// kernel: basic_block_forward.3
= control target key start
LH: loop header
LB: loop body
LE: loop exit
PB: predicated region body
PF: predicated region fallthrough
CT: control target
= control target key end

     0   :  { %s1008_s12 = smov 0   ;;  %s1178_s0 = inlined_call_operand.vmem [shape: bf16[512,36], index: 0, kind: input, shape index: {}]   ;;  %s1179_s1 = inlined_call_operand.vmem [shape: bf16[36,8], index: 1, kind: input, shape index: {}]   ;;  %s1180_s2 = inlined_call_operand.vmem [shape: f32[1,8], index: 2, kind: input, shape index: {}]   ;;  %s1181_s3 = inlined_call_operand.vmem [shape: bf16[512,8], index: 3, kind: output, shape index: {}]  }
   0x1 LB: > { %s777_s13 = sadd.s32 4294967295, %s986_s12   ;;  %p781_p0 = scmp.ge.s32.totalorder %s986_s12, 1  ;;  %s986_s12 = sphi %s1008_s12, %s13_s12  }
   0x2   : > { %p138_p1 = scmp.lt.s32.totalorder %s986_s12, 3 }
   0x4   : > { %p139_p2 = pnand %p781_p0, %p138_p1 }
   0x5   : > { %v961_v0 = vld [vmem:[%s1179_s1] sm:$0xff] (!%p139_p2)   ;;  %v962_v1 = vld [vmem:[%s1179_s1 + $0x8] sm:$0xff] (!%p139_p2)   ;;  %s782_s18 = sshll.u32 (!%p139_p2), %s777_s13, 5  ;;  %v963_v2 = vld [vmem:[%s1179_s1 + $0x10] ss:$0 sps:$4 sm:$0x33] (!%p139_p2)  }
   0x6   : > { %142 = sbr.rel (%p139_p2) target bundleno = 265 (0x109), region = 32  ;;  %907 = vmatprep.subr.bf16.mxu0 (!%p139_p2), %v961_v0  ;;  %945 = vmatprep.subr.bf16.mxu1 (!%p139_p2), %v961_v0  ;;  %p163_p3 = scmp.lt.s32.totalorder (!%p139_p2), %s782_s18, 63  ;;  %vm363_vm0 = vcmask (!%p139_p2), 1041408   ;;  %vm314_vm1 = vcmask (!%p139_p2), 293888   ;;  %v1070_v20 = vld [vmem:[%s1180_s2] ss:$0 sm:$0xff] (!%p139_p2) }
   0x7   : > { %908 = vmatpush3.bf16.msra.mxu0 (!%p139_p2), %v961_v0  ;;  %948 = vmatpush3.bf16.msra.mxu1 (!%p139_p2), %v961_v0  ;;  %v365_v3 = vsel (!%p139_p2), %vm363_vm0, %v963_v2, 0  ;;  %vm688_vm2 = vcmask (!%p139_p2), 60416  }
   0x8   : > { %909 = vmatprep.subr.bf16.mxu0 (!%p139_p2), %v962_v1  ;;  %946 = vmatprep.subr.bf16.mxu1 (!%p139_p2), %v962_v1 }
   0xb   : > { %910 = vmatpush3.bf16.msra.mxu0 (!%p139_p2), %v962_v1  ;;  %949 = vmatpush3.bf16.msra.mxu1 (!%p139_p2), %v962_v1 }
   0xc   : > { %951 = vmatprep.subr.msk.bf16.mxu0 (!%p139_p2), %vm363_vm0, %v963_v2  ;;  %952 = vmatprep.subr.msk.bf16.mxu1 (!%p139_p2), %vm363_vm0, %v963_v2 }
   0xd   : > { %s1183_s18 = smov (!%p163_p3, %s782_s18), 63 }
   0xe   : > { %s783_s21 = sshll.u32 %s1183_s18, 2 }
   0xf   : > { %s1033_s24 = scalar_lea.vmem %s1178_s0, %s783_s21  ;;  %912 = vmatpush3.bf16.msra.mxu0 %v365_v3  ;;  %950 = vmatpush3.bf16.msra.mxu1 %v365_v3  ;;  %s1083_s29 = scalar_lea.vmem %s1181_s3, %s783_s21 }
  0x10   : > { %v964_v4 = vld [vmem:[%s1033_s24] sm:$0xff]   ;;  %v966_v6 = vld [vmem:[%s1033_s24 + $0x8] sm:$0xff]   ;;  %v968_v8 = vld [vmem:[%s1033_s24 + $0x10] sm:$0xff]  }
  0x11   : > { %v965_v5 = vld [vmem:[%s1033_s24 + $0x40] sm:$0xff]   ;;  %913 = vmatprep.mubr.msk.bf16.mxu0 %vm314_vm1, %v964_v4  ;;  %v967_v7 = vld [vmem:[%s1033_s24 + $0x48] sm:$0xff]   ;;  %v969_v9 = vld [vmem:[%s1033_s24 + $0x50] sm:$0xff]  }
  0x12   : > { %929 = vmatprep.mubr.msk.bf16.mxu1 %vm314_vm1, %v965_v5  ;;  %914 = vmatmul.mubr.msk.bf16.vlgmr.msra.gmra.mrb[0].mxu0 %vm314_vm1, %v966_v6  ;;  %v970_v10 = vld [vmem:[%s1033_s24 + $0x18] sm:$0xff]   ;;  %v972_v12 = vld [vmem:[%s1033_s24 + $0x20] sm:$0xff]   ;;  %v974_v14 = vld [vmem:[%s1033_s24 + $0x28] sm:$0xff]  }
  0x13   : > { %930 = vmatmul.mubr.msk.bf16.vlgmr.msra.gmra.mrb[0].mxu1 %vm314_vm1, %v967_v7  ;;  %917 = vmatprep.mubr.msk.bf16.mxu0 %vm314_vm1, %v968_v8  ;;  %v971_v11 = vld [vmem:[%s1033_s24 + $0x58] sm:$0xff]   ;;  %v973_v13 = vld [vmem:[%s1033_s24 + $0x60] sm:$0xff]   ;;  %v975_v15 = vld [vmem:[%s1033_s24 + $0x68] sm:$0xff]  }
  0x14   : > { %933 = vmatprep.mubr.msk.bf16.mxu1 %vm314_vm1, %v969_v9  ;;  %v976_v16 = vld [vmem:[%s1033_s24 + $0x30] sm:$0xff]   ;;  %v978_v18 = vld [vmem:[%s1033_s24 + $0x38] sm:$0xff]  }
  0x15   : > { %v977_v17 = vld [vmem:[%s1033_s24 + $0x70] sm:$0xff]   ;;  %v979_v19 = vld [vmem:[%s1033_s24 + $0x78] sm:$0xff]  }
  0x1a   : > { %918 = vmatmul.mubr.msk.bf16.gmra.mrb[4].mxu0 %vm314_vm1, %v970_v10 }
  0x1b   : > { %934 = vmatmul.mubr.msk.bf16.gmra.mrb[4].mxu1 %vm314_vm1, %v971_v11  ;;  %921 = vmatprep.mubr.msk.bf16.mxu0 %vm314_vm1, %v972_v12 }
  0x1c   : > { %937 = vmatprep.mubr.msk.bf16.mxu1 %vm314_vm1, %v973_v13 }
  0x22   : > { %922 = vmatmul.mubr.msk.bf16.gmra.mrb[8].mxu0 %vm314_vm1, %v974_v14 }
  0x23   : > { %938 = vmatmul.mubr.msk.bf16.gmra.mrb[8].mxu1 %vm314_vm1, %v975_v15  ;;  %925 = vmatprep.mubr.msk.bf16.mxu0 %vm314_vm1, %v976_v16 }
  0x24   : > { %941 = vmatprep.mubr.msk.bf16.mxu1 %vm314_vm1, %v977_v17 }
  0x2a   : > { %926 = vmatmul.mubr.msk.bf16.gmra.mrb[12].mxu0 %vm314_vm1, %v978_v18 }
  0x2b   : > { %942 = vmatmul.mubr.msk.bf16.gmra.mrb[12].mxu1 %vm314_vm1, %v979_v19 }
  0xe5   : > { %v915_v21 = vpop.f32.mrb[0].mxu0 }
  0xe6   : > { %v931_v22 = vpop.f32.mrb[0].mxu1  ;;  %v410_v23 = vadd.f32 %v915_v21, %v1070_v20  ;;  %v401_v25 = vpop.f32.mrb[1].mxu0 }
  0xe7   : > { %v474_v24 = vadd.f32 %v931_v22, %v1070_v20  ;;  %v465_v26 = vpop.f32.mrb[1].mxu1  ;;  %v402_v27 = vadd.f32 %v1070_v20, %v401_v25  ;;  %v916_v29 = vpop.f32.mrb[2].mxu0 }
  0xe8   : > { %v466_v28 = vadd.f32 %v1070_v20, %v465_v26  ;;  %v932_v30 = vpop.f32.mrb[2].mxu1  ;;  %v530_v31 = vmax.f32 %v410_v23, 0.0  ;;  %v413_v33 = vadd.f32 %v916_v29, %v1070_v20  ;;  %v404_v35 = vpop.f32.mrb[3].mxu0 }
  0xe9   : > { %v546_v32 = vmax.f32 %v474_v24, 0.0  ;;  %v477_v34 = vadd.f32 %v932_v30, %v1070_v20  ;;  %v468_v36 = vpop.f32.mrb[3].mxu1  ;;  %v528_v37 = vmax.f32 %v402_v27, 0.0  ;;  %v405_v39 = vadd.f32 %v1070_v20, %v404_v35 }
  0xea   : > { %v544_v38 = vmax.f32 %v466_v28, 0.0  ;;  %v469_v40 = vadd.f32 %v1070_v20, %v468_v36  ;;  %v858_v41 = vpack.c.bf16 %v530_v31, %v530_v31  ;;  %v531_v43 = vmax.f32 %v413_v33, 0.0 }
  0xeb   : > { %v874_v42 = vpack.c.bf16 %v546_v32, %v546_v32  ;;  %v547_v44 = vmax.f32 %v477_v34, 0.0  ;;  %v856_v45 = vpack.c.bf16 %v528_v37, %v528_v37  ;;  %v529_v47 = vmax.f32 %v405_v39, 0.0 }
  0xec   : > { %v872_v46 = vpack.c.bf16 %v544_v38, %v544_v38  ;;  %v545_v48 = vmax.f32 %v469_v40, 0.0  ;;  %691 = vst.msk [vmem:[%s1083_s29 + $0x8] sm:$0xf] %vm688_vm2, %v858_v41  ;;  %v859_v49 = vpack.c.bf16 %v531_v43, %v531_v43 }
  0xed   : > { %707 = vst.msk [vmem:[%s1083_s29 + $0x48] sm:$0xf] %vm688_vm2, %v874_v42  ;;  %v875_v50 = vpack.c.bf16 %v547_v44, %v547_v44  ;;  %689 = vst.msk [vmem:[%s1083_s29] sm:$0xf] %vm688_vm2, %v856_v45  ;;  %v857_v51 = vpack.c.bf16 %v529_v47, %v529_v47  ;;  %v919_v53 = vpop.f32.mrb[4].mxu0 }
  0xee   : > { %705 = vst.msk [vmem:[%s1083_s29 + $0x40] sm:$0xf] %vm688_vm2, %v872_v46  ;;  %v873_v52 = vpack.c.bf16 %v545_v48, %v545_v48  ;;  %v935_v54 = vpop.f32.mrb[4].mxu1  ;;  %692 = vst.msk [vmem:[%s1083_s29 + $0xc] sm:$0xf] %vm688_vm2, %v859_v49  ;;  %v426_v55 = vadd.f32 %v919_v53, %v1070_v20  ;;  %v417_v57 = vpop.f32.mrb[5].mxu0 }
  0xef   : > { %708 = vst.msk [vmem:[%s1083_s29 + $0x4c] sm:$0xf] %vm688_vm2, %v875_v50  ;;  %v490_v56 = vadd.f32 %v935_v54, %v1070_v20  ;;  %v481_v58 = vpop.f32.mrb[5].mxu1  ;;  %690 = vst.msk [vmem:[%s1083_s29 + $0x4] sm:$0xf] %vm688_vm2, %v857_v51  ;;  %v418_v59 = vadd.f32 %v1070_v20, %v417_v57  ;;  %v920_v61 = vpop.f32.mrb[6].mxu0 }
  0xf0   : > { %706 = vst.msk [vmem:[%s1083_s29 + $0x44] sm:$0xf] %vm688_vm2, %v873_v52  ;;  %v482_v60 = vadd.f32 %v1070_v20, %v481_v58  ;;  %v936_v62 = vpop.f32.mrb[6].mxu1  ;;  %v534_v63 = vmax.f32 %v426_v55, 0.0  ;;  %v429_v1 = vadd.f32 %v920_v61, %v1070_v20  ;;  %v420_v3 = vpop.f32.mrb[7].mxu0 }
  0xf1   : > { %v550_v0 = vmax.f32 %v490_v56, 0.0  ;;  %v493_v2 = vadd.f32 %v936_v62, %v1070_v20  ;;  %v484_v4 = vpop.f32.mrb[7].mxu1  ;;  %v532_v5 = vmax.f32 %v418_v59, 0.0  ;;  %v421_v7 = vadd.f32 %v1070_v20, %v420_v3 }
  0xf2   : > { %v548_v6 = vmax.f32 %v482_v60, 0.0  ;;  %v485_v8 = vadd.f32 %v1070_v20, %v484_v4  ;;  %v862_v9 = vpack.c.bf16 %v534_v63, %v534_v63  ;;  %v535_v11 = vmax.f32 %v429_v1, 0.0 }
  0xf3   : > { %v878_v10 = vpack.c.bf16 %v550_v0, %v550_v0  ;;  %v551_v12 = vmax.f32 %v493_v2, 0.0  ;;  %v860_v13 = vpack.c.bf16 %v532_v5, %v532_v5  ;;  %v533_v15 = vmax.f32 %v421_v7, 0.0 }
  0xf4   : > { %v876_v14 = vpack.c.bf16 %v548_v6, %v548_v6  ;;  %v549_v16 = vmax.f32 %v485_v8, 0.0  ;;  %695 = vst.msk [vmem:[%s1083_s29 + $0x18] sm:$0xf] %vm688_vm2, %v862_v9  ;;  %v863_v17 = vpack.c.bf16 %v535_v11, %v535_v11 }
  0xf5   : > { %711 = vst.msk [vmem:[%s1083_s29 + $0x58] sm:$0xf] %vm688_vm2, %v878_v10  ;;  %v879_v18 = vpack.c.bf16 %v551_v12, %v551_v12  ;;  %693 = vst.msk [vmem:[%s1083_s29 + $0x10] sm:$0xf] %vm688_vm2, %v860_v13  ;;  %v861_v19 = vpack.c.bf16 %v533_v15, %v533_v15  ;;  %v923_v22 = vpop.f32.mrb[8].mxu0 }
  0xf6   : > { %709 = vst.msk [vmem:[%s1083_s29 + $0x50] sm:$0xf] %vm688_vm2, %v876_v14  ;;  %v877_v21 = vpack.c.bf16 %v549_v16, %v549_v16  ;;  %v939_v23 = vpop.f32.mrb[8].mxu1  ;;  %696 = vst.msk [vmem:[%s1083_s29 + $0x1c] sm:$0xf] %vm688_vm2, %v863_v17  ;;  %v442_v24 = vadd.f32 %v923_v22, %v1070_v20  ;;  %v433_v26 = vpop.f32.mrb[9].mxu0 }
  0xf7   : > { %712 = vst.msk [vmem:[%s1083_s29 + $0x5c] sm:$0xf] %vm688_vm2, %v879_v18  ;;  %v506_v25 = vadd.f32 %v939_v23, %v1070_v20  ;;  %v497_v27 = vpop.f32.mrb[9].mxu1  ;;  %694 = vst.msk [vmem:[%s1083_s29 + $0x14] sm:$0xf] %vm688_vm2, %v861_v19  ;;  %v434_v28 = vadd.f32 %v1070_v20, %v433_v26  ;;  %v924_v30 = vpop.f32.mrb[10].mxu0 }
  0xf8   : > { %710 = vst.msk [vmem:[%s1083_s29 + $0x54] sm:$0xf] %vm688_vm2, %v877_v21  ;;  %v498_v29 = vadd.f32 %v1070_v20, %v497_v27  ;;  %v940_v31 = vpop.f32.mrb[10].mxu1  ;;  %v538_v32 = vmax.f32 %v442_v24, 0.0  ;;  %v445_v34 = vadd.f32 %v924_v30, %v1070_v20  ;;  %v436_v36 = vpop.f32.mrb[11].mxu0 }
  0xf9   : > { %v554_v33 = vmax.f32 %v506_v25, 0.0  ;;  %v509_v35 = vadd.f32 %v940_v31, %v1070_v20  ;;  %v500_v37 = vpop.f32.mrb[11].mxu1  ;;  %v536_v38 = vmax.f32 %v434_v28, 0.0  ;;  %v437_v40 = vadd.f32 %v1070_v20, %v436_v36 }
  0xfa   : > { %v552_v39 = vmax.f32 %v498_v29, 0.0  ;;  %v501_v41 = vadd.f32 %v1070_v20, %v500_v37  ;;  %v866_v42 = vpack.c.bf16 %v538_v32, %v538_v32  ;;  %v539_v44 = vmax.f32 %v445_v34, 0.0 }
  0xfb   : > { %v882_v43 = vpack.c.bf16 %v554_v33, %v554_v33  ;;  %v555_v45 = vmax.f32 %v509_v35, 0.0  ;;  %v864_v46 = vpack.c.bf16 %v536_v38, %v536_v38  ;;  %v537_v48 = vmax.f32 %v437_v40, 0.0 }
  0xfc   : > { %v880_v47 = vpack.c.bf16 %v552_v39, %v552_v39  ;;  %v553_v49 = vmax.f32 %v501_v41, 0.0  ;;  %699 = vst.msk [vmem:[%s1083_s29 + $0x28] sm:$0xf] %vm688_vm2, %v866_v42  ;;  %v867_v50 = vpack.c.bf16 %v539_v44, %v539_v44 }
  0xfd   : > { %715 = vst.msk [vmem:[%s1083_s29 + $0x68] sm:$0xf] %vm688_vm2, %v882_v43  ;;  %v883_v51 = vpack.c.bf16 %v555_v45, %v555_v45  ;;  %697 = vst.msk [vmem:[%s1083_s29 + $0x20] sm:$0xf] %vm688_vm2, %v864_v46  ;;  %v865_v52 = vpack.c.bf16 %v537_v48, %v537_v48  ;;  %v927_v54 = vpop.f32.mrb[12].mxu0 }
  0xfe   : > { %713 = vst.msk [vmem:[%s1083_s29 + $0x60] sm:$0xf] %vm688_vm2, %v880_v47  ;;  %v881_v53 = vpack.c.bf16 %v553_v49, %v553_v49  ;;  %v943_v55 = vpop.f32.mrb[12].mxu1  ;;  %700 = vst.msk [vmem:[%s1083_s29 + $0x2c] sm:$0xf] %vm688_vm2, %v867_v50  ;;  %v458_v56 = vadd.f32 %v927_v54, %v1070_v20  ;;  %v449_v58 = vpop.f32.mrb[13].mxu0 }
  0xff   : > { %716 = vst.msk [vmem:[%s1083_s29 + $0x6c] sm:$0xf] %vm688_vm2, %v883_v51  ;;  %v522_v57 = vadd.f32 %v943_v55, %v1070_v20  ;;  %v513_v59 = vpop.f32.mrb[13].mxu1  ;;  %698 = vst.msk [vmem:[%s1083_s29 + $0x24] sm:$0xf] %vm688_vm2, %v865_v52  ;;  %v450_v60 = vadd.f32 %v1070_v20, %v449_v58  ;;  %v928_v62 = vpop.f32.mrb[14].mxu0 }
 0x100   : > { %714 = vst.msk [vmem:[%s1083_s29 + $0x64] sm:$0xf] %vm688_vm2, %v881_v53  ;;  %v514_v61 = vadd.f32 %v1070_v20, %v513_v59  ;;  %v944_v63 = vpop.f32.mrb[14].mxu1  ;;  %v542_v0 = vmax.f32 %v458_v56, 0.0  ;;  %v461_v2 = vadd.f32 %v928_v62, %v1070_v20  ;;  %v452_v4 = vpop.f32.mrb[15].mxu0 }
 0x101   : > { %v558_v1 = vmax.f32 %v522_v57, 0.0  ;;  %v525_v3 = vadd.f32 %v944_v63, %v1070_v20  ;;  %v516_v5 = vpop.f32.mrb[15].mxu1  ;;  %v540_v6 = vmax.f32 %v450_v60, 0.0  ;;  %v453_v8 = vadd.f32 %v1070_v20, %v452_v4 }
 0x102   : > { %v556_v7 = vmax.f32 %v514_v61, 0.0  ;;  %v517_v9 = vadd.f32 %v1070_v20, %v516_v5  ;;  %v870_v10 = vpack.c.bf16 %v542_v0, %v542_v0  ;;  %v543_v12 = vmax.f32 %v461_v2, 0.0 }
 0x103   : > { %v886_v11 = vpack.c.bf16 %v558_v1, %v558_v1  ;;  %v559_v13 = vmax.f32 %v525_v3, 0.0  ;;  %v868_v14 = vpack.c.bf16 %v540_v6, %v540_v6  ;;  %v541_v16 = vmax.f32 %v453_v8, 0.0 }
 0x104   : > { %v884_v15 = vpack.c.bf16 %v556_v7, %v556_v7  ;;  %v557_v17 = vmax.f32 %v517_v9, 0.0  ;;  %703 = vst.msk [vmem:[%s1083_s29 + $0x38] sm:$0xf] %vm688_vm2, %v870_v10  ;;  %v871_v18 = vpack.c.bf16 %v543_v12, %v543_v12 }
 0x105   : > { %719 = vst.msk [vmem:[%s1083_s29 + $0x78] sm:$0xf] %vm688_vm2, %v886_v11  ;;  %v887_v19 = vpack.c.bf16 %v559_v13, %v559_v13  ;;  %701 = vst.msk [vmem:[%s1083_s29 + $0x30] sm:$0xf] %vm688_vm2, %v868_v14  ;;  %v869_v20 = vpack.c.bf16 %v541_v16, %v541_v16 }
 0x106   : > { %717 = vst.msk [vmem:[%s1083_s29 + $0x70] sm:$0xf] %vm688_vm2, %v884_v15  ;;  %v885_v21 = vpack.c.bf16 %v557_v17, %v557_v17  ;;  %704 = vst.msk [vmem:[%s1083_s29 + $0x3c] sm:$0xf] %vm688_vm2, %v871_v18 }
 0x107   : > { %720 = vst.msk [vmem:[%s1083_s29 + $0x7c] sm:$0xf] %vm688_vm2, %v887_v19  ;;  %702 = vst.msk [vmem:[%s1083_s29 + $0x34] sm:$0xf] %vm688_vm2, %v869_v20 }
 0x108   : > { %718 = vst.msk [vmem:[%s1083_s29 + $0x74] sm:$0xf] %vm688_vm2, %v885_v21 }
 0x109 PF: > { %s13_s12 = sadd.s32 1, %s986_s12  }
 0x10a   : > { %p10_p4 = scmp.ge.s32.totalorder %s13_s12, 4  }
 0x10c   :  { %12 = sbr.rel (!%p10_p4) target bundleno = 1 (0x1), region = 62 }

// kernel: basic_block_forward.4
= control target key start
LH: loop header
LB: loop body
LE: loop exit
PB: predicated region body
PF: predicated region fallthrough
CT: control target
= control target key end

     0   :  { %s941_s12 = smov 0   ;;  %s1105_s0 = inlined_call_operand.vmem [shape: bf16[512,4], index: 0, kind: input, shape index: {}]   ;;  %s1106_s1 = inlined_call_operand.vmem [shape: bf16[4,8], index: 1, kind: input, shape index: {}]   ;;  %s1107_s2 = inlined_call_operand.vmem [shape: f32[1,8], index: 2, kind: input, shape index: {}]   ;;  %s1108_s3 = inlined_call_operand.vmem [shape: bf16[512,8], index: 3, kind: output, shape index: {}]  }
   0x1 LB: > { %s726_s13 = sadd.s32 4294967295, %s919_s12   ;;  %p730_p0 = scmp.ge.s32.totalorder %s919_s12, 1  ;;  %s919_s12 = sphi %s941_s12, %s13_s12  }
   0x2   : > { %p138_p1 = scmp.lt.s32.totalorder %s919_s12, 3 }
   0x4   : > { %p139_p2 = pnand %p730_p0, %p138_p1 }
   0x5   : > { %v207_v0 = vld [vmem:[%s1106_s1] sm:$0x3] (!%p139_p2)  ;;  %vm344_vm0 = vcmask (!%p139_p2), 1041408   ;;  %s731_s16 = sshll.u32 (!%p139_p2), %s726_s13, 5  ;;  %vm295_vm1 = vcmask (!%p139_p2), 31744   ;;  %vm637_vm2 = vcmask (!%p139_p2), 60416  }
   0x6   : > { %142 = sbr.rel (%p139_p2) target bundleno = 263 (0x107), region = 32  ;;  %887 = vmatprep.subr.msk.bf16.mxu0 (!%p139_p2), %vm344_vm0, %v207_v0  ;;  %888 = vmatprep.subr.msk.bf16.mxu1 (!%p139_p2), %vm344_vm0, %v207_v0  ;;  %v346_v1 = vsel (!%p139_p2), %vm344_vm0, %v207_v0, 0  ;;  %p163_p3 = scmp.lt.s32.totalorder (!%p139_p2), %s731_s16, 63  ;;  %v997_v18 = vld [vmem:[%s1107_s2] ss:$0 sm:$0xff] (!%p139_p2) }
   0x7   : > { %852 = vmatpush3.bf16.msra.mxu0 (!%p139_p2), %v346_v1  ;;  %886 = vmatpush3.bf16.msra.mxu1 (!%p139_p2), %v346_v1 }
   0xd   : > { %s1110_s16 = smov (!%p163_p3, %s731_s16), 63 }
   0xe   : > { %s732_s17 = sshll.u32 %s1110_s16, 2 }
   0xf   : > { %s960_s20 = scalar_lea.vmem %s1105_s0, %s732_s17  ;;  %s1005_s25 = scalar_lea.vmem %s1108_s3, %s732_s17 }
  0x10   : > { %v897_v2 = vld [vmem:[%s960_s20] sm:$0xff]   ;;  %v899_v4 = vld [vmem:[%s960_s20 + $0x8] sm:$0xff]   ;;  %v901_v6 = vld [vmem:[%s960_s20 + $0x10] sm:$0xff]  }
  0x11   : > { %v898_v3 = vld [vmem:[%s960_s20 + $0x40] sm:$0xff]   ;;  %853 = vmatprep.mubr.msk.bf16.mxu0 %vm295_vm1, %v897_v2  ;;  %v900_v5 = vld [vmem:[%s960_s20 + $0x48] sm:$0xff]   ;;  %v902_v7 = vld [vmem:[%s960_s20 + $0x50] sm:$0xff]  }
  0x12   : > { %869 = vmatprep.mubr.msk.bf16.mxu1 %vm295_vm1, %v898_v3  ;;  %854 = vmatmul.mubr.msk.bf16.vlgmr.msra.gmra.mrb[0].mxu0 %vm295_vm1, %v899_v4  ;;  %v903_v8 = vld [vmem:[%s960_s20 + $0x18] sm:$0xff]   ;;  %v905_v10 = vld [vmem:[%s960_s20 + $0x20] sm:$0xff]   ;;  %v907_v12 = vld [vmem:[%s960_s20 + $0x28] sm:$0xff]  }
  0x13   : > { %870 = vmatmul.mubr.msk.bf16.vlgmr.msra.gmra.mrb[0].mxu1 %vm295_vm1, %v900_v5  ;;  %857 = vmatprep.mubr.msk.bf16.mxu0 %vm295_vm1, %v901_v6  ;;  %v904_v9 = vld [vmem:[%s960_s20 + $0x58] sm:$0xff]   ;;  %v906_v11 = vld [vmem:[%s960_s20 + $0x60] sm:$0xff]   ;;  %v908_v13 = vld [vmem:[%s960_s20 + $0x68] sm:$0xff]  }
  0x14   : > { %873 = vmatprep.mubr.msk.bf16.mxu1 %vm295_vm1, %v902_v7  ;;  %v909_v14 = vld [vmem:[%s960_s20 + $0x30] sm:$0xff]   ;;  %v911_v16 = vld [vmem:[%s960_s20 + $0x38] sm:$0xff]  }
  0x15   : > { %v910_v15 = vld [vmem:[%s960_s20 + $0x70] sm:$0xff]   ;;  %v912_v17 = vld [vmem:[%s960_s20 + $0x78] sm:$0xff]  }
  0x1a   : > { %858 = vmatmul.mubr.msk.bf16.gmra.mrb[4].mxu0 %vm295_vm1, %v903_v8 }
  0x1b   : > { %874 = vmatmul.mubr.msk.bf16.gmra.mrb[4].mxu1 %vm295_vm1, %v904_v9  ;;  %861 = vmatprep.mubr.msk.bf16.mxu0 %vm295_vm1, %v905_v10 }
  0x1c   : > { %877 = vmatprep.mubr.msk.bf16.mxu1 %vm295_vm1, %v906_v11 }
  0x22   : > { %862 = vmatmul.mubr.msk.bf16.gmra.mrb[8].mxu0 %vm295_vm1, %v907_v12 }
  0x23   : > { %878 = vmatmul.mubr.msk.bf16.gmra.mrb[8].mxu1 %vm295_vm1, %v908_v13  ;;  %865 = vmatprep.mubr.msk.bf16.mxu0 %vm295_vm1, %v909_v14 }
  0x24   : > { %881 = vmatprep.mubr.msk.bf16.mxu1 %vm295_vm1, %v910_v15 }
  0x2a   : > { %866 = vmatmul.mubr.msk.bf16.gmra.mrb[12].mxu0 %vm295_vm1, %v911_v16 }
  0x2b   : > { %882 = vmatmul.mubr.msk.bf16.gmra.mrb[12].mxu1 %vm295_vm1, %v912_v17 }
  0xe5   : > { %v855_v19 = vpop.f32.mrb[0].mxu0 }
  0xe6   : > { %v391_v20 = vadd.f32 %v855_v19, %v997_v18  ;;  %v871_v21 = vpop.f32.mrb[0].mxu1  ;;  %v382_v22 = vpop.f32.mrb[1].mxu0 }
  0xe7   : > { %v455_v23 = vadd.f32 %v871_v21, %v997_v18  ;;  %v383_v24 = vadd.f32 %v997_v18, %v382_v22  ;;  %v446_v25 = vpop.f32.mrb[1].mxu1  ;;  %v856_v26 = vpop.f32.mrb[2].mxu0 }
  0xe8   : > { %v804_v27 = vpack.c.bf16 %v391_v20, %v391_v20  ;;  %v447_v28 = vadd.f32 %v997_v18, %v446_v25  ;;  %v394_v29 = vadd.f32 %v856_v26, %v997_v18  ;;  %v872_v30 = vpop.f32.mrb[2].mxu1  ;;  %v385_v31 = vpop.f32.mrb[3].mxu0 }
  0xe9   : > { %v820_v32 = vpack.c.bf16 %v455_v23, %v455_v23  ;;  %v802_v33 = vpack.c.bf16 %v383_v24, %v383_v24  ;;  %v458_v34 = vadd.f32 %v872_v30, %v997_v18  ;;  %v386_v35 = vadd.f32 %v997_v18, %v385_v31  ;;  %v449_v36 = vpop.f32.mrb[3].mxu1 }
  0xea   : > { %640 = vst.msk [vmem:[%s1005_s25 + $0x8] sm:$0xf] %vm637_vm2, %v804_v27  ;;  %v818_v37 = vpack.c.bf16 %v447_v28, %v447_v28  ;;  %v805_v38 = vpack.c.bf16 %v394_v29, %v394_v29  ;;  %v450_v39 = vadd.f32 %v997_v18, %v449_v36 }
  0xeb   : > { %656 = vst.msk [vmem:[%s1005_s25 + $0x48] sm:$0xf] %vm637_vm2, %v820_v32  ;;  %638 = vst.msk [vmem:[%s1005_s25] sm:$0xf] %vm637_vm2, %v802_v33  ;;  %v821_v40 = vpack.c.bf16 %v458_v34, %v458_v34  ;;  %v803_v41 = vpack.c.bf16 %v386_v35, %v386_v35 }
  0xec   : > { %654 = vst.msk [vmem:[%s1005_s25 + $0x40] sm:$0xf] %vm637_vm2, %v818_v37  ;;  %641 = vst.msk [vmem:[%s1005_s25 + $0xc] sm:$0xf] %vm637_vm2, %v805_v38  ;;  %v819_v42 = vpack.c.bf16 %v450_v39, %v450_v39 }
  0xed   : > { %657 = vst.msk [vmem:[%s1005_s25 + $0x4c] sm:$0xf] %vm637_vm2, %v821_v40  ;;  %639 = vst.msk [vmem:[%s1005_s25 + $0x4] sm:$0xf] %vm637_vm2, %v803_v41  ;;  %v859_v43 = vpop.f32.mrb[4].mxu0 }
  0xee   : > { %655 = vst.msk [vmem:[%s1005_s25 + $0x44] sm:$0xf] %vm637_vm2, %v819_v42  ;;  %v407_v44 = vadd.f32 %v859_v43, %v997_v18  ;;  %v875_v45 = vpop.f32.mrb[4].mxu1  ;;  %v398_v46 = vpop.f32.mrb[5].mxu0 }
  0xef   : > { %v471_v47 = vadd.f32 %v875_v45, %v997_v18  ;;  %v399_v48 = vadd.f32 %v997_v18, %v398_v46  ;;  %v462_v49 = vpop.f32.mrb[5].mxu1  ;;  %v860_v50 = vpop.f32.mrb[6].mxu0 }
  0xf0   : > { %v808_v51 = vpack.c.bf16 %v407_v44, %v407_v44  ;;  %v463_v52 = vadd.f32 %v997_v18, %v462_v49  ;;  %v410_v53 = vadd.f32 %v860_v50, %v997_v18  ;;  %v876_v54 = vpop.f32.mrb[6].mxu1  ;;  %v401_v55 = vpop.f32.mrb[7].mxu0 }
  0xf1   : > { %v824_v56 = vpack.c.bf16 %v471_v47, %v471_v47  ;;  %v806_v57 = vpack.c.bf16 %v399_v48, %v399_v48  ;;  %v474_v58 = vadd.f32 %v876_v54, %v997_v18  ;;  %v402_v59 = vadd.f32 %v997_v18, %v401_v55  ;;  %v465_v60 = vpop.f32.mrb[7].mxu1 }
  0xf2   : > { %644 = vst.msk [vmem:[%s1005_s25 + $0x18] sm:$0xf] %vm637_vm2, %v808_v51  ;;  %v822_v61 = vpack.c.bf16 %v463_v52, %v463_v52  ;;  %v809_v62 = vpack.c.bf16 %v410_v53, %v410_v53  ;;  %v466_v63 = vadd.f32 %v997_v18, %v465_v60 }
  0xf3   : > { %660 = vst.msk [vmem:[%s1005_s25 + $0x58] sm:$0xf] %vm637_vm2, %v824_v56  ;;  %642 = vst.msk [vmem:[%s1005_s25 + $0x10] sm:$0xf] %vm637_vm2, %v806_v57  ;;  %v825_v0 = vpack.c.bf16 %v474_v58, %v474_v58  ;;  %v807_v1 = vpack.c.bf16 %v402_v59, %v402_v59 }
  0xf4   : > { %658 = vst.msk [vmem:[%s1005_s25 + $0x50] sm:$0xf] %vm637_vm2, %v822_v61  ;;  %645 = vst.msk [vmem:[%s1005_s25 + $0x1c] sm:$0xf] %vm637_vm2, %v809_v62  ;;  %v823_v2 = vpack.c.bf16 %v466_v63, %v466_v63 }
  0xf5   : > { %661 = vst.msk [vmem:[%s1005_s25 + $0x5c] sm:$0xf] %vm637_vm2, %v825_v0  ;;  %643 = vst.msk [vmem:[%s1005_s25 + $0x14] sm:$0xf] %vm637_vm2, %v807_v1  ;;  %v863_v3 = vpop.f32.mrb[8].mxu0 }
  0xf6   : > { %659 = vst.msk [vmem:[%s1005_s25 + $0x54] sm:$0xf] %vm637_vm2, %v823_v2  ;;  %v423_v4 = vadd.f32 %v863_v3, %v997_v18  ;;  %v879_v5 = vpop.f32.mrb[8].mxu1  ;;  %v414_v6 = vpop.f32.mrb[9].mxu0 }
  0xf7   : > { %v487_v7 = vadd.f32 %v879_v5, %v997_v18  ;;  %v415_v8 = vadd.f32 %v997_v18, %v414_v6  ;;  %v478_v9 = vpop.f32.mrb[9].mxu1  ;;  %v864_v10 = vpop.f32.mrb[10].mxu0 }
  0xf8   : > { %v812_v11 = vpack.c.bf16 %v423_v4, %v423_v4  ;;  %v479_v12 = vadd.f32 %v997_v18, %v478_v9  ;;  %v426_v13 = vadd.f32 %v864_v10, %v997_v18  ;;  %v880_v14 = vpop.f32.mrb[10].mxu1  ;;  %v417_v15 = vpop.f32.mrb[11].mxu0 }
  0xf9   : > { %v828_v16 = vpack.c.bf16 %v487_v7, %v487_v7  ;;  %v810_v17 = vpack.c.bf16 %v415_v8, %v415_v8  ;;  %v490_v19 = vadd.f32 %v880_v14, %v997_v18  ;;  %v418_v20 = vadd.f32 %v997_v18, %v417_v15  ;;  %v481_v21 = vpop.f32.mrb[11].mxu1 }
  0xfa   : > { %648 = vst.msk [vmem:[%s1005_s25 + $0x28] sm:$0xf] %vm637_vm2, %v812_v11  ;;  %v826_v22 = vpack.c.bf16 %v479_v12, %v479_v12  ;;  %v813_v23 = vpack.c.bf16 %v426_v13, %v426_v13  ;;  %v482_v24 = vadd.f32 %v997_v18, %v481_v21 }
  0xfb   : > { %664 = vst.msk [vmem:[%s1005_s25 + $0x68] sm:$0xf] %vm637_vm2, %v828_v16  ;;  %646 = vst.msk [vmem:[%s1005_s25 + $0x20] sm:$0xf] %vm637_vm2, %v810_v17  ;;  %v829_v25 = vpack.c.bf16 %v490_v19, %v490_v19  ;;  %v811_v26 = vpack.c.bf16 %v418_v20, %v418_v20 }
  0xfc   : > { %662 = vst.msk [vmem:[%s1005_s25 + $0x60] sm:$0xf] %vm637_vm2, %v826_v22  ;;  %649 = vst.msk [vmem:[%s1005_s25 + $0x2c] sm:$0xf] %vm637_vm2, %v813_v23  ;;  %v827_v27 = vpack.c.bf16 %v482_v24, %v482_v24 }
  0xfd   : > { %665 = vst.msk [vmem:[%s1005_s25 + $0x6c] sm:$0xf] %vm637_vm2, %v829_v25  ;;  %647 = vst.msk [vmem:[%s1005_s25 + $0x24] sm:$0xf] %vm637_vm2, %v811_v26  ;;  %v867_v28 = vpop.f32.mrb[12].mxu0 }
  0xfe   : > { %663 = vst.msk [vmem:[%s1005_s25 + $0x64] sm:$0xf] %vm637_vm2, %v827_v27  ;;  %v439_v29 = vadd.f32 %v867_v28, %v997_v18  ;;  %v883_v30 = vpop.f32.mrb[12].mxu1  ;;  %v430_v31 = vpop.f32.mrb[13].mxu0 }
  0xff   : > { %v503_v32 = vadd.f32 %v883_v30, %v997_v18  ;;  %v431_v33 = vadd.f32 %v997_v18, %v430_v31  ;;  %v494_v34 = vpop.f32.mrb[13].mxu1  ;;  %v868_v35 = vpop.f32.mrb[14].mxu0 }
 0x100   : > { %v816_v36 = vpack.c.bf16 %v439_v29, %v439_v29  ;;  %v495_v37 = vadd.f32 %v997_v18, %v494_v34  ;;  %v442_v38 = vadd.f32 %v868_v35, %v997_v18  ;;  %v884_v39 = vpop.f32.mrb[14].mxu1  ;;  %v433_v40 = vpop.f32.mrb[15].mxu0 }
 0x101   : > { %v832_v41 = vpack.c.bf16 %v503_v32, %v503_v32  ;;  %v814_v42 = vpack.c.bf16 %v431_v33, %v431_v33  ;;  %v506_v43 = vadd.f32 %v884_v39, %v997_v18  ;;  %v434_v44 = vadd.f32 %v997_v18, %v433_v40  ;;  %v497_v45 = vpop.f32.mrb[15].mxu1 }
 0x102   : > { %652 = vst.msk [vmem:[%s1005_s25 + $0x38] sm:$0xf] %vm637_vm2, %v816_v36  ;;  %v830_v46 = vpack.c.bf16 %v495_v37, %v495_v37  ;;  %v817_v47 = vpack.c.bf16 %v442_v38, %v442_v38  ;;  %v498_v48 = vadd.f32 %v997_v18, %v497_v45 }
 0x103   : > { %668 = vst.msk [vmem:[%s1005_s25 + $0x78] sm:$0xf] %vm637_vm2, %v832_v41  ;;  %650 = vst.msk [vmem:[%s1005_s25 + $0x30] sm:$0xf] %vm637_vm2, %v814_v42  ;;  %v833_v49 = vpack.c.bf16 %v506_v43, %v506_v43  ;;  %v815_v50 = vpack.c.bf16 %v434_v44, %v434_v44 }
 0x104   : > { %666 = vst.msk [vmem:[%s1005_s25 + $0x70] sm:$0xf] %vm637_vm2, %v830_v46  ;;  %653 = vst.msk [vmem:[%s1005_s25 + $0x3c] sm:$0xf] %vm637_vm2, %v817_v47  ;;  %v831_v51 = vpack.c.bf16 %v498_v48, %v498_v48 }
 0x105   : > { %669 = vst.msk [vmem:[%s1005_s25 + $0x7c] sm:$0xf] %vm637_vm2, %v833_v49  ;;  %651 = vst.msk [vmem:[%s1005_s25 + $0x34] sm:$0xf] %vm637_vm2, %v815_v50 }
 0x106   : > { %667 = vst.msk [vmem:[%s1005_s25 + $0x74] sm:$0xf] %vm637_vm2, %v831_v51 }
 0x107 PF: > { %s13_s12 = sadd.s32 1, %s919_s12  }
 0x108   : > { %p10_p4 = scmp.ge.s32.totalorder %s13_s12, 4  }
 0x10a   :  { %12 = sbr.rel (!%p10_p4) target bundleno = 1 (0x1), region = 62 }

// kernel: basic_block_forward.5
= control target key start
LH: loop header
LB: loop body
LE: loop exit
PB: predicated region body
PF: predicated region fallthrough
CT: control target
= control target key end

     0   :  { %s1089_s15 = smov 0   ;;  %s1287_s0 = inlined_call_operand.vmem [shape: bf16[512,72], index: 0, kind: input, shape index: {}]   ;;  %s1288_s1 = inlined_call_operand.vmem [shape: bf16[72,8], index: 1, kind: input, shape index: {}]   ;;  %s1289_s2 = inlined_call_operand.vmem [shape: f32[1,8], index: 2, kind: input, shape index: {}]   ;;  %s1290_s3 = inlined_call_operand.vmem [shape: bf16[512,8], index: 3, kind: input, shape index: {}]   ;;  %s1291_s4 = inlined_call_operand.vmem [shape: f32[512,8], index: 4, kind: output, shape index: {}]  }
   0x1 LB: > { %s822_s16 = sadd.s32 4294967295, %s1062_s15   ;;  %p826_p0 = scmp.ge.s32.totalorder %s1062_s15, 1  ;;  %s1062_s15 = sphi %s1089_s15, %s14_s15  }
   0x2   : > { %p174_p1 = scmp.lt.s32.totalorder %s1062_s15, 3 }
   0x4   : > { %p175_p2 = pnand %p826_p0, %p174_p1 }
   0x5   : > { %v1035_v0 = vld [vmem:[%s1288_s1] sm:$0xff] (!%p175_p2)   ;;  %v1036_v1 = vld [vmem:[%s1288_s1 + $0x8] sm:$0xff] (!%p175_p2)   ;;  %s827_s21 = sshll.u32 (!%p175_p2), %s822_s16, 5  ;;  %v1037_v2 = vld [vmem:[%s1288_s1 + $0x10] sm:$0xff] (!%p175_p2)   ;;  %vm379_vm0 = vcmask (!%p175_p2), 588800   ;;  %vm428_vm1 = vcmask (!%p175_p2), 1043456  }
   0x6   : > { %178 = sbr.rel (%p175_p2) target bundleno = 272 (0x110), region = 36  ;;  %973 = vmatprep.subr.bf16.mxu0 (!%p175_p2), %v1035_v0  ;;  %1015 = vmatprep.subr.bf16.mxu1 (!%p175_p2), %v1035_v0  ;;  %p206_p3 = scmp.lt.s32.totalorder (!%p175_p2), %s827_s21, 63  ;;  %v1038_v3 = vld [vmem:[%s1288_s1 + $0x18] sm:$0xff] (!%p175_p2)   ;;  %v1039_v6 = vld [vmem:[%s1288_s1 + $0x20] ss:$0 sps:$4 sm:$0xff] (!%p175_p2)   ;;  %vm721_vm2 = vcmask (!%p175_p2), 64512  }
   0x7   : > { %974 = vmatpush3.bf16.msra.mxu0 (!%p175_p2), %v1035_v0  ;;  %1020 = vmatpush3.bf16.msra.mxu1 (!%p175_p2), %v1035_v0  ;;  %v430_v7 = vsel (!%p175_p2), %vm428_vm1, %v1039_v6, 0  ;;  %v1168_v26 = vld [vmem:[%s1289_s2] ss:$0 sm:$0xff] (!%p175_p2) }
   0x8   : > { %975 = vmatprep.subr.bf16.mxu0 (!%p175_p2), %v1036_v1  ;;  %1016 = vmatprep.subr.bf16.mxu1 (!%p175_p2), %v1036_v1 }
   0xb   : > { %976 = vmatpush3.bf16.msra.mxu0 (!%p175_p2), %v1036_v1  ;;  %1021 = vmatpush3.bf16.msra.mxu1 (!%p175_p2), %v1036_v1 }
   0xc   : > { %977 = vmatprep.subr.bf16.mxu0 (!%p175_p2), %v1037_v2  ;;  %1017 = vmatprep.subr.bf16.mxu1 (!%p175_p2), %v1037_v2 }
   0xd   : > { %s1293_s21 = smov (!%p206_p3, %s827_s21), 63 }
   0xe   : > { %s828_s24 = sshll.u32 %s1293_s21, 2  ;;  %s832_s11 = sshll.u32 %s1293_s21, 3 }
   0xf   : > { %s1117_s29 = scalar_lea.vmem %s1287_s0, %s828_s24  ;;  %978 = vmatpush3.bf16.msra.mxu0 %v1037_v2  ;;  %1022 = vmatpush3.bf16.msra.mxu1 %v1037_v2  ;;  %s1159_s8 = scalar_lea.vmem %s1290_s3, %s828_s24 }
  0x10   : > { %v1040_v4 = vld [vmem:[%s1117_s29] sm:$0xff]   ;;  %979 = vmatprep.subr.bf16.mxu0 %v1038_v3  ;;  %1018 = vmatprep.subr.bf16.mxu1 %v1038_v3  ;;  %v1042_v8 = vld [vmem:[%s1117_s29 + $0x8] sm:$0xff]   ;;  %v1044_v10 = vld [vmem:[%s1117_s29 + $0x10] sm:$0xff]   ;;  %s1180_s14 = scalar_lea.vmem %s1291_s4, %s832_s11 }
  0x11   : > { %v1041_v5 = vld [vmem:[%s1117_s29 + $0x40] sm:$0xff]   ;;  %983 = vmatprep.mubr.msk.bf16.mxu0 %vm379_vm0, %v1040_v4  ;;  %v1043_v9 = vld [vmem:[%s1117_s29 + $0x48] sm:$0xff]   ;;  %v1045_v11 = vld [vmem:[%s1117_s29 + $0x50] sm:$0xff]  }
  0x12   : > { %999 = vmatprep.mubr.msk.bf16.mxu1 %vm379_vm0, %v1041_v5  ;;  %v1046_v12 = vld [vmem:[%s1117_s29 + $0x18] sm:$0xff]   ;;  %v1048_v14 = vld [vmem:[%s1117_s29 + $0x20] sm:$0xff]   ;;  %v1050_v16 = vld [vmem:[%s1117_s29 + $0x28] sm:$0xff]  }
  0x13   : > { %980 = vmatpush3.bf16.msra.mxu0 %v1038_v3  ;;  %1023 = vmatpush3.bf16.msra.mxu1 %v1038_v3  ;;  %v1047_v13 = vld [vmem:[%s1117_s29 + $0x58] sm:$0xff]   ;;  %v1049_v15 = vld [vmem:[%s1117_s29 + $0x60] sm:$0xff]   ;;  %v1051_v17 = vld [vmem:[%s1117_s29 + $0x68] sm:$0xff]  }
  0x14   : > { %1025 = vmatprep.subr.msk.bf16.mxu0 %vm428_vm1, %v1039_v6  ;;  %1026 = vmatprep.subr.msk.bf16.mxu1 %vm428_vm1, %v1039_v6  ;;  %v1052_v18 = vld [vmem:[%s1117_s29 + $0x30] sm:$0xff]   ;;  %v1054_v20 = vld [vmem:[%s1117_s29 + $0x38] sm:$0xff]   ;;  %v937_v22 = vld [vmem:[%s1159_s8 + $0x8] sm:$0xff]  }
  0x15   : > { %v1053_v19 = vld [vmem:[%s1117_s29 + $0x70] sm:$0xff]   ;;  %v1055_v21 = vld [vmem:[%s1117_s29 + $0x78] sm:$0xff]   ;;  %v945_v23 = vld [vmem:[%s1159_s8 + $0x48] sm:$0xff]   ;;  %v879_v27 = vunpack.c.l.bf16 %v937_v22  ;;  %v880_v33 = vunpack.c.h.bf16 %v937_v22 }
  0x16   : > { %v874_v24 = vld [vmem:[%s1159_s8] sm:$0xff]   ;;  %v911_v28 = vunpack.c.l.bf16 %v945_v23  ;;  %v912_v38 = vunpack.c.h.bf16 %v945_v23  ;;  %v939_v55 = vld [vmem:[%s1159_s8 + $0x18] sm:$0xff]   ;;  %v938_v61 = vld [vmem:[%s1159_s8 + $0x10] sm:$0xff]  }
  0x17   : > { %982 = vmatpush3.bf16.msra.mxu0 %v430_v7  ;;  %1024 = vmatpush3.bf16.msra.mxu1 %v430_v7  ;;  %v944_v25 = vld [vmem:[%s1159_s8 + $0x40] sm:$0xff]   ;;  %v875_v31 = vunpack.c.l.bf16 %v874_v24  ;;  %v876_v39 = vunpack.c.h.bf16 %v874_v24  ;;  %v947_v56 = vld [vmem:[%s1159_s8 + $0x58] sm:$0xff]   ;;  %v946_v62 = vld [vmem:[%s1159_s8 + $0x50] sm:$0xff]   ;;  %v887_v5 = vunpack.c.l.bf16 %v939_v55  ;;  %v884_v23 = vunpack.c.h.bf16 %v938_v61 }
  0x18   : > { %v907_v32 = vunpack.c.l.bf16 %v944_v25  ;;  %v908_v44 = vunpack.c.h.bf16 %v944_v25  ;;  %v919_v6 = vunpack.c.l.bf16 %v947_v56  ;;  %v916_v24 = vunpack.c.h.bf16 %v946_v62 }
  0x1a   : > { %984 = vmatmul.mubr.msk.bf16.vlgmr.msra.gmra.mrb[0].mxu0 %vm379_vm0, %v1042_v8  ;;  %1000 = vmatmul.mubr.msk.bf16.vlgmr.msra.gmra.mrb[0].mxu1 %vm379_vm0, %v1043_v9 }
  0x1b   : > { %987 = vmatprep.mubr.msk.bf16.mxu0 %vm379_vm0, %v1044_v10  ;;  %1003 = vmatprep.mubr.msk.bf16.mxu1 %vm379_vm0, %v1045_v11  ;;  %v883_v11 = vunpack.c.l.bf16 %v938_v61 }
  0x22   : > { %988 = vmatmul.mubr.msk.bf16.gmra.mrb[4].mxu0 %vm379_vm0, %v1046_v12  ;;  %1004 = vmatmul.mubr.msk.bf16.gmra.mrb[4].mxu1 %vm379_vm0, %v1047_v13  ;;  %v915_v12 = vunpack.c.l.bf16 %v946_v62 }
  0x23   : > { %991 = vmatprep.mubr.msk.bf16.mxu0 %vm379_vm0, %v1048_v14  ;;  %1007 = vmatprep.mubr.msk.bf16.mxu1 %vm379_vm0, %v1049_v15 }
  0x2a   : > { %992 = vmatmul.mubr.msk.bf16.gmra.mrb[8].mxu0 %vm379_vm0, %v1050_v16  ;;  %1008 = vmatmul.mubr.msk.bf16.gmra.mrb[8].mxu1 %vm379_vm0, %v1051_v17  ;;  %v888_v17 = vunpack.c.h.bf16 %v939_v55 }
  0x2b   : > { %995 = vmatprep.mubr.msk.bf16.mxu0 %vm379_vm0, %v1052_v18  ;;  %1011 = vmatprep.mubr.msk.bf16.mxu1 %vm379_vm0, %v1053_v19  ;;  %v920_v18 = vunpack.c.h.bf16 %v947_v56 }
  0x32   : > { %996 = vmatmul.mubr.msk.bf16.gmra.mrb[12].mxu0 %vm379_vm0, %v1054_v20  ;;  %1012 = vmatmul.mubr.msk.bf16.gmra.mrb[12].mxu1 %vm379_vm0, %v1055_v21 }
  0xed   : > { %v985_v29 = vpop.f32.mrb[0].mxu0  ;;  %v1001_v30 = vpop.f32.mrb[0].mxu1 }
  0xee   : > { %v475_v34 = vadd.f32 %v985_v29, %v1168_v26  ;;  %v539_v35 = vadd.f32 %v1001_v30, %v1168_v26  ;;  %v466_v36 = vpop.f32.mrb[1].mxu0  ;;  %v530_v37 = vpop.f32.mrb[1].mxu1 }
  0xef   : > { %v467_v40 = vadd.f32 %v1168_v26, %v466_v36  ;;  %v531_v41 = vadd.f32 %v1168_v26, %v530_v37  ;;  %v986_v42 = vpop.f32.mrb[2].mxu0  ;;  %v1002_v43 = vpop.f32.mrb[2].mxu1  ;;  %v941_v36 = vld [vmem:[%s1159_s8 + $0x28] sm:$0xff]  }
  0xf0   : > { %v659_v45 = vadd.f32 %v879_v27, %v475_v34  ;;  %v675_v46 = vadd.f32 %v911_v28, %v539_v35  ;;  %v478_v47 = vadd.f32 %v986_v42, %v1168_v26  ;;  %v542_v48 = vadd.f32 %v1002_v43, %v1168_v26  ;;  %v469_v49 = vpop.f32.mrb[3].mxu0  ;;  %v533_v50 = vpop.f32.mrb[3].mxu1  ;;  %v949_v37 = vld [vmem:[%s1159_s8 + $0x68] sm:$0xff]   ;;  %v940_v42 = vld [vmem:[%s1159_s8 + $0x20] sm:$0xff]  }
  0xf1   : > { %v657_v51 = vadd.f32 %v875_v31, %v467_v40  ;;  %v673_v52 = vadd.f32 %v907_v32, %v531_v41  ;;  %v470_v53 = vadd.f32 %v1168_v26, %v469_v49  ;;  %v534_v54 = vadd.f32 %v1168_v26, %v533_v50  ;;  %v948_v43 = vld [vmem:[%s1159_s8 + $0x60] sm:$0xff]  }
  0xf2   : > { %v691_v57 = vmax.f32 %v659_v45, 0.0  ;;  %v707_v58 = vmax.f32 %v675_v46, 0.0  ;;  %v660_v59 = vadd.f32 %v880_v33, %v478_v47  ;;  %v676_v60 = vadd.f32 %v912_v38, %v542_v48 }
  0xf3   : > { %v689_v63 = vmax.f32 %v657_v51, 0.0  ;;  %v705_v0 = vmax.f32 %v673_v52, 0.0  ;;  %v658_v1 = vadd.f32 %v876_v39, %v470_v53  ;;  %v674_v2 = vadd.f32 %v908_v44, %v534_v54 }
  0xf4   : > { %724 = vst.msk [vmem:[%s1180_s14 + $0x10] sm:$0xff] %vm721_vm2, %v691_v57  ;;  %740 = vst.msk [vmem:[%s1180_s14 + $0x90] sm:$0xff] %vm721_vm2, %v707_v58  ;;  %v692_v3 = vmax.f32 %v660_v59, 0.0  ;;  %v708_v4 = vmax.f32 %v676_v60, 0.0  ;;  %v895_v50 = vunpack.c.l.bf16 %v941_v36  ;;  %v927_v51 = vunpack.c.l.bf16 %v949_v37 }
  0xf5   : > { %722 = vst.msk [vmem:[%s1180_s14] sm:$0xff] %vm721_vm2, %v689_v63  ;;  %738 = vst.msk [vmem:[%s1180_s14 + $0x80] sm:$0xff] %vm721_vm2, %v705_v0  ;;  %v690_v7 = vmax.f32 %v658_v1, 0.0  ;;  %v706_v8 = vmax.f32 %v674_v2, 0.0  ;;  %v989_v9 = vpop.f32.mrb[4].mxu0  ;;  %v1005_v10 = vpop.f32.mrb[4].mxu1  ;;  %v891_v56 = vunpack.c.l.bf16 %v940_v42  ;;  %v923_v57 = vunpack.c.l.bf16 %v948_v43 }
  0xf6   : > { %725 = vst.msk [vmem:[%s1180_s14 + $0x18] sm:$0xff] %vm721_vm2, %v692_v3  ;;  %741 = vst.msk [vmem:[%s1180_s14 + $0x98] sm:$0xff] %vm721_vm2, %v708_v4  ;;  %v491_v13 = vadd.f32 %v989_v9, %v1168_v26  ;;  %v555_v14 = vadd.f32 %v1005_v10, %v1168_v26  ;;  %v482_v15 = vpop.f32.mrb[5].mxu0  ;;  %v546_v16 = vpop.f32.mrb[5].mxu1  ;;  %v896_v62 = vunpack.c.h.bf16 %v941_v36  ;;  %v928_v63 = vunpack.c.h.bf16 %v949_v37 }
  0xf7   : > { %723 = vst.msk [vmem:[%s1180_s14 + $0x8] sm:$0xff] %vm721_vm2, %v690_v7  ;;  %739 = vst.msk [vmem:[%s1180_s14 + $0x88] sm:$0xff] %vm721_vm2, %v706_v8  ;;  %v483_v19 = vadd.f32 %v1168_v26, %v482_v15  ;;  %v547_v20 = vadd.f32 %v1168_v26, %v546_v16  ;;  %v990_v21 = vpop.f32.mrb[6].mxu0  ;;  %v1006_v22 = vpop.f32.mrb[6].mxu1  ;;  %v892_v4 = vunpack.c.h.bf16 %v940_v42  ;;  %v943_v16 = vld [vmem:[%s1159_s8 + $0x38] sm:$0xff]  }
  0xf8   : > { %v663_v25 = vadd.f32 %v887_v5, %v491_v13  ;;  %v679_v27 = vadd.f32 %v919_v6, %v555_v14  ;;  %v494_v28 = vadd.f32 %v990_v21, %v1168_v26  ;;  %v558_v29 = vadd.f32 %v1006_v22, %v1168_v26  ;;  %v485_v30 = vpop.f32.mrb[7].mxu0  ;;  %v549_v31 = vpop.f32.mrb[7].mxu1  ;;  %v942_v22 = vld [vmem:[%s1159_s8 + $0x30] sm:$0xff]  }
  0xf9   : > { %v661_v32 = vadd.f32 %v883_v11, %v483_v19  ;;  %v677_v33 = vadd.f32 %v915_v12, %v547_v20  ;;  %v486_v34 = vadd.f32 %v1168_v26, %v485_v30  ;;  %v550_v35 = vadd.f32 %v1168_v26, %v549_v31 }
  0xfa   : > { %v695_v38 = vmax.f32 %v663_v25, 0.0  ;;  %v711_v39 = vmax.f32 %v679_v27, 0.0  ;;  %v664_v40 = vadd.f32 %v888_v17, %v494_v28  ;;  %v680_v41 = vadd.f32 %v920_v18, %v558_v29  ;;  %v951_v17 = vld [vmem:[%s1159_s8 + $0x78] sm:$0xff]  }
  0xfb   : > { %v693_v44 = vmax.f32 %v661_v32, 0.0  ;;  %v709_v45 = vmax.f32 %v677_v33, 0.0  ;;  %v662_v46 = vadd.f32 %v884_v23, %v486_v34  ;;  %v678_v47 = vadd.f32 %v916_v24, %v550_v35  ;;  %v950_v23 = vld [vmem:[%s1159_s8 + $0x70] sm:$0xff]  }
  0xfc   : > { %728 = vst.msk [vmem:[%s1180_s14 + $0x30] sm:$0xff] %vm721_vm2, %v695_v38  ;;  %744 = vst.msk [vmem:[%s1180_s14 + $0xb0] sm:$0xff] %vm721_vm2, %v711_v39  ;;  %v696_v48 = vmax.f32 %v664_v40, 0.0  ;;  %v712_v49 = vmax.f32 %v680_v41, 0.0  ;;  %v924_v5 = vunpack.c.h.bf16 %v948_v43  ;;  %v903_v31 = vunpack.c.l.bf16 %v943_v16 }
  0xfd   : > { %726 = vst.msk [vmem:[%s1180_s14 + $0x20] sm:$0xff] %vm721_vm2, %v693_v44  ;;  %742 = vst.msk [vmem:[%s1180_s14 + $0xa0] sm:$0xff] %vm721_vm2, %v709_v45  ;;  %v694_v52 = vmax.f32 %v662_v46, 0.0  ;;  %v710_v53 = vmax.f32 %v678_v47, 0.0  ;;  %v993_v54 = vpop.f32.mrb[8].mxu0  ;;  %v1009_v55 = vpop.f32.mrb[8].mxu1  ;;  %v935_v32 = vunpack.c.l.bf16 %v951_v17  ;;  %v899_v37 = vunpack.c.l.bf16 %v942_v22 }
  0xfe   : > { %729 = vst.msk [vmem:[%s1180_s14 + $0x38] sm:$0xff] %vm721_vm2, %v696_v48  ;;  %745 = vst.msk [vmem:[%s1180_s14 + $0xb8] sm:$0xff] %vm721_vm2, %v712_v49  ;;  %v507_v58 = vadd.f32 %v993_v54, %v1168_v26  ;;  %v571_v59 = vadd.f32 %v1009_v55, %v1168_v26  ;;  %v498_v60 = vpop.f32.mrb[9].mxu0  ;;  %v562_v61 = vpop.f32.mrb[9].mxu1  ;;  %v931_v38 = vunpack.c.l.bf16 %v950_v23  ;;  %v904_v43 = vunpack.c.h.bf16 %v943_v16 }
  0xff   : > { %727 = vst.msk [vmem:[%s1180_s14 + $0x28] sm:$0xff] %vm721_vm2, %v694_v52  ;;  %743 = vst.msk [vmem:[%s1180_s14 + $0xa8] sm:$0xff] %vm721_vm2, %v710_v53  ;;  %v499_v0 = vadd.f32 %v1168_v26, %v498_v60  ;;  %v563_v1 = vadd.f32 %v1168_v26, %v562_v61  ;;  %v994_v2 = vpop.f32.mrb[10].mxu0  ;;  %v1010_v3 = vpop.f32.mrb[10].mxu1  ;;  %v936_v44 = vunpack.c.h.bf16 %v951_v17  ;;  %v900_v49 = vunpack.c.h.bf16 %v942_v22 }
 0x100   : > { %v667_v6 = vadd.f32 %v895_v50, %v507_v58  ;;  %v683_v7 = vadd.f32 %v927_v51, %v571_v59  ;;  %v510_v8 = vadd.f32 %v994_v2, %v1168_v26  ;;  %v574_v9 = vadd.f32 %v1010_v3, %v1168_v26  ;;  %v501_v10 = vpop.f32.mrb[11].mxu0  ;;  %v565_v11 = vpop.f32.mrb[11].mxu1 }
 0x101   : > { %v665_v12 = vadd.f32 %v891_v56, %v499_v0  ;;  %v681_v13 = vadd.f32 %v923_v57, %v563_v1  ;;  %v502_v14 = vadd.f32 %v1168_v26, %v501_v10  ;;  %v566_v15 = vadd.f32 %v1168_v26, %v565_v11 }
 0x102   : > { %v699_v18 = vmax.f32 %v667_v6, 0.0  ;;  %v715_v19 = vmax.f32 %v683_v7, 0.0  ;;  %v668_v20 = vadd.f32 %v896_v62, %v510_v8  ;;  %v684_v21 = vadd.f32 %v928_v63, %v574_v9 }
 0x103   : > { %v697_v24 = vmax.f32 %v665_v12, 0.0  ;;  %v713_v25 = vmax.f32 %v681_v13, 0.0  ;;  %v666_v27 = vadd.f32 %v892_v4, %v502_v14  ;;  %v682_v28 = vadd.f32 %v924_v5, %v566_v15 }
 0x104   : > { %732 = vst.msk [vmem:[%s1180_s14 + $0x50] sm:$0xff] %vm721_vm2, %v699_v18  ;;  %748 = vst.msk [vmem:[%s1180_s14 + $0xd0] sm:$0xff] %vm721_vm2, %v715_v19  ;;  %v700_v29 = vmax.f32 %v668_v20, 0.0  ;;  %v716_v30 = vmax.f32 %v684_v21, 0.0  ;;  %v932_v50 = vunpack.c.h.bf16 %v950_v23 }
 0x105   : > { %730 = vst.msk [vmem:[%s1180_s14 + $0x40] sm:$0xff] %vm721_vm2, %v697_v24  ;;  %746 = vst.msk [vmem:[%s1180_s14 + $0xc0] sm:$0xff] %vm721_vm2, %v713_v25  ;;  %v698_v33 = vmax.f32 %v666_v27, 0.0  ;;  %v714_v34 = vmax.f32 %v682_v28, 0.0  ;;  %v997_v35 = vpop.f32.mrb[12].mxu0  ;;  %v1013_v36 = vpop.f32.mrb[12].mxu1 }
 0x106   : > { %733 = vst.msk [vmem:[%s1180_s14 + $0x58] sm:$0xff] %vm721_vm2, %v700_v29  ;;  %749 = vst.msk [vmem:[%s1180_s14 + $0xd8] sm:$0xff] %vm721_vm2, %v716_v30  ;;  %v523_v39 = vadd.f32 %v997_v35, %v1168_v26  ;;  %v587_v40 = vadd.f32 %v1013_v36, %v1168_v26  ;;  %v514_v41 = vpop.f32.mrb[13].mxu0  ;;  %v578_v42 = vpop.f32.mrb[13].mxu1 }
 0x107   : > { %731 = vst.msk [vmem:[%s1180_s14 + $0x48] sm:$0xff] %vm721_vm2, %v698_v33  ;;  %747 = vst.msk [vmem:[%s1180_s14 + $0xc8] sm:$0xff] %vm721_vm2, %v714_v34  ;;  %v515_v45 = vadd.f32 %v1168_v26, %v514_v41  ;;  %v579_v46 = vadd.f32 %v1168_v26, %v578_v42  ;;  %v998_v47 = vpop.f32.mrb[14].mxu0  ;;  %v1014_v48 = vpop.f32.mrb[14].mxu1 }
 0x108   : > { %v671_v51 = vadd.f32 %v903_v31, %v523_v39  ;;  %v687_v52 = vadd.f32 %v935_v32, %v587_v40  ;;  %v526_v53 = vadd.f32 %v998_v47, %v1168_v26  ;;  %v590_v54 = vadd.f32 %v1014_v48, %v1168_v26  ;;  %v517_v55 = vpop.f32.mrb[15].mxu0  ;;  %v581_v56 = vpop.f32.mrb[15].mxu1 }
 0x109   : > { %v669_v57 = vadd.f32 %v899_v37, %v515_v45  ;;  %v685_v58 = vadd.f32 %v931_v38, %v579_v46  ;;  %v518_v59 = vadd.f32 %v1168_v26, %v517_v55  ;;  %v582_v60 = vadd.f32 %v1168_v26, %v581_v56 }
 0x10a   : > { %v703_v61 = vmax.f32 %v671_v51, 0.0  ;;  %v719_v62 = vmax.f32 %v687_v52, 0.0  ;;  %v672_v63 = vadd.f32 %v904_v43, %v526_v53  ;;  %v688_v0 = vadd.f32 %v936_v44, %v590_v54 }
 0x10b   : > { %v701_v1 = vmax.f32 %v669_v57, 0.0  ;;  %v717_v2 = vmax.f32 %v685_v58, 0.0  ;;  %v670_v3 = vadd.f32 %v900_v49, %v518_v59  ;;  %v686_v4 = vadd.f32 %v932_v50, %v582_v60 }
 0x10c   : > { %736 = vst.msk [vmem:[%s1180_s14 + $0x70] sm:$0xff] %vm721_vm2, %v703_v61  ;;  %752 = vst.msk [vmem:[%s1180_s14 + $0xf0] sm:$0xff] %vm721_vm2, %v719_v62  ;;  %v704_v5 = vmax.f32 %v672_v63, 0.0  ;;  %v720_v6 = vmax.f32 %v688_v0, 0.0 }
 0x10d   : > { %734 = vst.msk [vmem:[%s1180_s14 + $0x60] sm:$0xff] %vm721_vm2, %v701_v1  ;;  %750 = vst.msk [vmem:[%s1180_s14 + $0xe0] sm:$0xff] %vm721_vm2, %v717_v2  ;;  %v702_v26 = vmax.f32 %v670_v3, 0.0  ;;  %v718_v7 = vmax.f32 %v686_v4, 0.0 }
 0x10e   : > { %737 = vst.msk [vmem:[%s1180_s14 + $0x78] sm:$0xff] %vm721_vm2, %v704_v5  ;;  %753 = vst.msk [vmem:[%s1180_s14 + $0xf8] sm:$0xff] %vm721_vm2, %v720_v6 }
 0x10f   : > { %735 = vst.msk [vmem:[%s1180_s14 + $0x68] sm:$0xff] %vm721_vm2, %v702_v26  ;;  %751 = vst.msk [vmem:[%s1180_s14 + $0xe8] sm:$0xff] %vm721_vm2, %v718_v7 }
 0x110 PF: > { %s14_s15 = sadd.s32 1, %s1062_s15  }
 0x111   : > { %p11_p4 = scmp.ge.s32.totalorder %s14_s15, 4  }
 0x113   :  { %13 = sbr.rel (!%p11_p4) target bundleno = 1 (0x1), region = 69 }

</bundles_post_ra>
